<compile_context>
chip_gen: v7x
topology: tpu7x:2x2x1
jax: 0.10.0
libtpu: 0.0.40
codegen_flags: <defaults>
</compile_context>

<pallas_src>
import functools

import numpy as np

import jax
import jax.numpy as jnp
from jax.experimental import pallas as pl
from jax.experimental.pallas import tpu as pltpu


LANES = 128
# 2048 rows x 128 lanes = 1 MiB per f32 chunk (512 KiB bf16).  Two slots per
# dtype => <= ~3 MiB VMEM, far under every generation's scoped-VMEM limit.
DEFAULT_CHUNK_ROWS = 2048


def _row_granularity(dtype) -> int:
    """Sublane packing granularity: (8,128) f32, (16,128) bf16, (32,128) int8."""
    return max(8, 32 // max(1, jnp.dtype(dtype).itemsize))


def _abs_pow(x, p: float):
    """|x|^p; integer p uses VALU multiply chains (no EUP pow)."""
    if p == 1.0:
        return jnp.abs(x)
    if p == 2.0:
        return x * x
    if float(p).is_integer() and p > 0:
        e = int(p)
        if e % 2 == 0:
            base, e = x * x, e // 2
        else:
            base = jnp.abs(x)
        result = None
        while e:
            if e & 1:
                result = base if result is None else result * base
            e >>= 1
            if e:
                base = base * base
        return result
    return jnp.abs(x) ** p                       # truly non-integer p -> EUP


def _chunk_partial(x, p: float):
    """(rows,128) chunk -> (8,128) f32 lane/sublane partial (VALU adds only)."""
    v = _abs_pow(x.astype(jnp.float32), p)
    return v.reshape(-1, 8, LANES).sum(axis=0)


def _process_param(ref, buf_ref, sem_ref, out_ref, rows: int, p: float,
                   chunk_rows: int):
    """Stream one (rows,128) HBM parameter through a double-buffered VMEM
    chunk buffer and accumulate its (8,128) |x|^p lane-partial into out_ref."""
    n_full = rows // chunk_rows
    rem = rows - n_full * chunk_rows

    def start_copy(start_row, n_rows, slot):
        pltpu.make_async_copy(
            ref.at[pl.ds(start_row, n_rows), :],
            buf_ref.at[pl.ds(slot * chunk_rows, n_rows), :],
            sem_ref.at[slot],
        ).start()

    def wait_copy(n_rows, slot):
        # .wait() only needs matching shapes + the semaphore slot.
        pltpu.make_async_copy(
            ref.at[pl.ds(0, n_rows), :],
            buf_ref.at[pl.ds(slot * chunk_rows, n_rows), :],
            sem_ref.at[slot],
        ).wait()

    out_ref[...] = jnp.zeros_like(out_ref)

    if n_full > 0:
        start_copy(0, chunk_rows, 0)                       # prime slot 0

        @pl.loop(0, n_full)
        def _(t):
            slot = t % 2
            nxt = t + 1

            @pl.when(nxt < n_full)                         # prefetch next chunk
            def _():
                start_copy(nxt * chunk_rows, chunk_rows, 1 - slot)

            if rem > 0:
                @pl.when(nxt == n_full)                    # prefetch remainder
                def _():
                    start_copy(n_full * chunk_rows, rem, 1 - slot)

            wait_copy(chunk_rows, slot)
            off = pl.multiple_of(slot * chunk_rows, 8)
            x = buf_ref[pl.ds(off, chunk_rows), :]
            out_ref[...] += _chunk_partial(x, p)[None]

    if rem > 0:
        slot = n_full % 2                                  # static python int
        if n_full == 0:
            start_copy(0, rem, 0)
        wait_copy(rem, slot)
        x = buf_ref[pl.ds(slot * chunk_rows, rem), :]
        out_ref[...] += _chunk_partial(x, p)[None]
    # TODO(synk): cross-parameter prefetch (hide the first DMA of param j+1
    # behind the last chunk of param j) is not done; bubble is one DMA latency
    # per parameter.


def _build_kernel(rows_list, buf_index, num_bufs, p, chunk_rows):
    num_params = len(rows_list)

    def kernel(*refs):
        param_refs = refs[:num_params]
        out_ref = refs[num_params]
        buf_refs = refs[num_params + 1: num_params + 1 + num_bufs]
        sem_ref = refs[num_params + 1 + num_bufs]
        pid = pl.program_id(0)

        for j in range(num_params):                        # static dispatch
            def _run(j=j):
                _process_param(param_refs[j], buf_refs[buf_index[j]], sem_ref,
                               out_ref, rows_list[j], p, chunk_rows)
            pl.when(pid == j)(_run)

    return kernel


def _prep_param(w):
    """Flatten + zero-pad to a whole number of (gran,128) rows, reshaped to
    (rows,128).  Params whose size is already a multiple are a pure reshape;
    otherwise the pad copies only that (small) parameter."""
    gran = _row_granularity(w.dtype)
    flat = jnp.ravel(w)
    n = flat.size
    block = gran * LANES
    padded = -(-n // block) * block
    if padded != n:
        flat = jnp.pad(flat, (0, padded - n))              # |0|^p = 0 for p > 0
    return flat.reshape(-1, LANES)


def fused_param_norms(params, norm_type, chunk_rows: int = DEFAULT_CHUNK_ROWS):
    """Lp norm of every array in `params`, via ONE fused Pallas kernel that
    streams each parameter straight out of HBM (no pack/concatenate pass)."""
    p = float(norm_type)
    if p <= 0:
        raise ValueError("norm_type must be > 0")
    num_params = len(params)
    if num_params == 0:
        return jnp.zeros((0,), jnp.float32)
    sizes = [int(np.prod(w.shape)) for w in params]
    idxs = [j for j in range(num_params) if sizes[j] > 0]
    if not idxs:
        return jnp.zeros((num_params,), jnp.float32)

    prepped, rows_list, dtypes_list = [], [], []
    for j in idxs:
        w = params[j]
        if chunk_rows % _row_granularity(w.dtype) != 0:
            raise ValueError("chunk_rows must be a multiple of the dtype's "
                             "sublane packing granularity")
        buf2d = _prep_param(w)
        prepped.append(buf2d)
        rows_list.append(int(buf2d.shape[0]))
        dtypes_list.append(jnp.dtype(w.dtype))

    buf_dtypes = []
    for dt in dtypes_list:
        if dt not in buf_dtypes:
            buf_dtypes.append(dt)
    buf_index = [buf_dtypes.index(dt) for dt in dtypes_list]

    n_act = len(prepped)
    total_elems = sum(r * LANES for r in rows_list)
    in_bytes = sum(r * LANES * dt.itemsize
                   for r, dt in zip(rows_list, dtypes_list))
    non_integer = not float(p).is_integer()
    cost = pl.CostEstimate(
        flops=3 * total_elems,
        transcendentals=total_elems if non_integer else 0,
        bytes_accessed=in_bytes + n_act * 8 * LANES * 4,
    )

    kernel = _build_kernel(rows_list, buf_index, len(buf_dtypes), p, chunk_rows)

    partials = pl.pallas_call(
        kernel,
        out_shape=jax.ShapeDtypeStruct((n_act, 8, LANES), jnp.float32),
        grid=(n_act,),
        in_specs=[pl.BlockSpec(memory_space=pl.ANY)] * n_act,
        out_specs=pl.BlockSpec((1, 8, LANES), lambda i: (i, 0, 0)),
        scratch_shapes=(
            [pltpu.VMEM((2 * chunk_rows, LANES), dt) for dt in buf_dtypes]
            + [pltpu.SemaphoreType.DMA((2,))]),
        compiler_params=pltpu.CompilerParams(
            dimension_semantics=("parallel",)),
        cost_estimate=cost,
    )(*prepped)

    sums = jnp.sum(partials, axis=(1, 2))                  # tiny finalize in XLA
    if p == 2.0:
        norms_act = jnp.sqrt(sums)
    elif p == 1.0:
        norms_act = sums
    else:
        norms_act = sums ** (1.0 / p)
    if n_act == num_params:
        return norms_act
    return jnp.zeros((num_params,), jnp.float32).at[
        jnp.asarray(idxs, jnp.int32)].set(norms_act)


# ----------------------------------------------------------------------------
# Differentiable wrapper: residual-free backward (no packed residual, no
# repeat/unpack); residuals are just the original parameter references plus
# the per-parameter scalar norms.
# ----------------------------------------------------------------------------
@functools.partial(jax.custom_vjp, nondiff_argnums=(1,))
def param_norms(params, norm_type):
    return fused_param_norms(list(params), norm_type)


def _param_norms_fwd(params, norm_type):
    norms = fused_param_norms(list(params), norm_type)
    return norms, (params, norms)


def _param_norms_bwd(norm_type, res, g):
    params, norms = res
    p = float(norm_type)
    grads = []
    for j, w in enumerate(params):
        wf = w.astype(jnp.float32)
        nrm = norms[j]
        if p == 2.0:
            gw = wf * jnp.where(nrm > 0, 1.0 / nrm, 0.0)
        elif p == 1.0:
            gw = jnp.sign(wf)
        else:
            # d||w||_p / dw = sign(w) |w|^(p-1) ||w||_p^(1-p)
            scale = jnp.where(nrm > 0, nrm ** (1.0 - p), 0.0)
            gw = jnp.sign(wf) * jnp.abs(wf) ** (p - 1.0) * scale
        grads.append((g[j] * gw).astype(w.dtype))
    return (tuple(grads),)


param_norms.defvjp(_param_norms_fwd, _param_norms_bwd)


# ----------------------------------------------------------------------------
# LnLoss forward: mirrors the PyTorch module semantics.
#   - skip named parameters whose name contains 'Kernel'
#   - add the norm of every CKConvBase.conv_kernel
#   - loss = weight_loss * sum_of_norms
# TODO(synk): PyTorch walks model.named_parameters()/modules(); here the model
# is represented explicitly as a dict of named params + a list of conv_kernels.
# ----------------------------------------------------------------------------
class LnLoss:
    def __init__(self, weight_loss: float, norm_type: int):
        if norm_type <= 0:
            raise ValueError("norm_type must be a positive norm order")
        self.weight_loss = float(weight_loss)
        self.norm_type = norm_type

    def __call__(self, named_params: dict, conv_kernels=()) -> jax.Array:
        params = [w for name, w in named_params.items() if "Kernel" not in name]
        params += list(conv_kernels)
        if not params:
            return jnp.float32(0.0)
        norms = param_norms(tuple(params), self.norm_type)
        return jnp.float32(self.weight_loss) * jnp.sum(norms)


# ----------------------------------------------------------------------------
# Pure-JAX reference for verification.
# ----------------------------------------------------------------------------
def ln_loss_ref(named_params, conv_kernels, weight_loss, norm_type):
    p = float(norm_type)
    loss = jnp.float32(0.0)
    for name, w in named_params.items():
        if "Kernel" in name:
            continue
        loss = loss + jnp.sum(jnp.abs(w.astype(jnp.float32)) ** p) ** (1.0 / p)
    for ck in conv_kernels:
        loss = loss + jnp.sum(jnp.abs(ck.astype(jnp.float32)) ** p) ** (1.0 / p)
    return jnp.float32(weight_loss) * loss


if __name__ == "__main__":
    key = jax.random.PRNGKey(0)
    k1, k2, k3, k4, k5, k6, k7 = jax.random.split(key, 7)

    # Synthetic "model": deterministic parameters (a small CKCNN-like set).
    named_params = {
        "conv1.weight": jax.random.normal(k1, (4, 4, 3, 3), jnp.float32),
        "conv1.bias": jax.random.normal(k2, (4,), jnp.float32),
        "linear.weight": jax.random.normal(k3, (8, 32), jnp.float32),
        # bf16 parameter: exercises per-dtype buffers (no silent f32 upcast)
        "proj.weight": jax.random.normal(k6, (32, 64), jnp.float32).astype(jnp.bfloat16),
        # excluded: name contains 'Kernel'
        "ckconv.Kernel.net.0.weight": jax.random.normal(k4, (32, 32), jnp.float32),
    }
    conv_kernels = [
        # CKConvBase.conv_kernel tensors
        jax.random.normal(k5, (4, 4, 512), jnp.float32),   # 64 rows of 128
        jax.random.normal(k7, (4, 4, 560), jnp.float32),   # 70 rows -> padded to 72
    ]

    weight_loss = 0.1

    # Forward: L2 / L1 / L3 (the latter exercises the integer-p VALU chain).
    for nt in (2, 1, 3):
        loss = jax.block_until_ready(
            LnLoss(weight_loss, nt)(named_params, conv_kernels))
        ref = jax.block_until_ready(
            ln_loss_ref(named_params, conv_kernels, weight_loss, nt))
        assert jnp.allclose(loss, ref, rtol=1e-5, atol=1e-5), (nt, loss, ref)

    # Multi-chunk double-buffered streaming path (chunk smaller than a param,
    # exercises prime / prefetch / remainder handling).
    small_chunk = jax.block_until_ready(
        fused_param_norms(conv_kernels, 2, chunk_rows=16))
    ref_norms = jnp.stack(
        [jnp.sqrt(jnp.sum(jnp.square(ck))) for ck in conv_kernels])
    assert jnp.allclose(small_chunk, ref_norms, rtol=1e-5, atol=1e-5), (
        small_chunk, ref_norms)

    # Gradients (custom_vjp, residual-free) vs. pure-JAX reference gradients.
    loss_fn = LnLoss(weight_loss, 2)
    g_pallas = jax.grad(lambda ps: loss_fn(ps, conv_kernels))(named_params)
    g_ref = jax.grad(
        lambda ps: ln_loss_ref(ps, conv_kernels, weight_loss, 2))(named_params)
    for name, w in named_params.items():
        got = g_pallas[name].astype(jnp.float32)
        want = g_ref[name].astype(jnp.float32)
        if w.dtype == jnp.bfloat16:
            rtol, atol = 2e-2, 1e-4
        else:
            rtol, atol = 1e-4, 1e-6
        assert jnp.allclose(got, want, rtol=rtol, atol=atol), name

    print("KERNEL_OK")
</pallas_src>

<mosaic_0001>
module attributes {stable_mosaic.version = 11 : i64} {
  func.func @kernel(%arg0: i32, %arg1: memref<8x128xf32, #tpu.memory_space<any>>, %arg2: memref<8x128xf32, #tpu.memory_space<any>>, %arg3: memref<8x128xf32, #tpu.memory_space<any>>, %arg4: memref<16x128xbf16, #tpu.memory_space<any>>, %arg5: memref<64x128xf32, #tpu.memory_space<any>>, %arg6: memref<72x128xf32, #tpu.memory_space<any>>, %arg7: memref<1x8x128xf32, #tpu.memory_space<vmem>>, %arg8: memref<4096x128xf32, #tpu.memory_space<vmem>>, %arg9: memref<4096x128xbf16, #tpu.memory_space<vmem>>, %arg10: memref<2x!tpu.dma_semaphore, #tpu.memory_space<semaphore_mem>>) attributes {dimension_semantics = [#tpu.dimension_semantics<parallel>], iteration_bounds = array<i64: 6>, scalar_prefetch = 0 : i64, scratch_operands = 3 : i64, tpu.core_type = #tpu.core_type<tc>, window_params = [{}, {}, {}, {}, {}, {}, {transform_indices = @transform_6, window_bounds = array<i64: 1, 8, 128>}]} {
    %c0_i32 = arith.constant 0 : i32
    %0 = arith.cmpi eq, %arg0, %c0_i32 : i32
    %1 = arith.extui %0 : i1 to i32
    %c0_i32_0 = arith.constant 0 : i32
    %2 = arith.cmpi ne, %1, %c0_i32_0 : i32
    scf.if %2 {
      %cst = arith.constant 0.000000e+00 : f32
      %18 = vector.broadcast %cst : f32 to vector<1x8x128xf32>
      %c0 = arith.constant 0 : index
      %c0_6 = arith.constant 0 : index
      %c0_7 = arith.constant 0 : index
      %19 = vector.load %arg7[%c0, %c0_6, %c0_7] : memref<1x8x128xf32, #tpu.memory_space<vmem>>, vector<1x8x128xf32>
      tpu.vector_store %arg7[%c0, %c0_6, %c0_7], %18 {strides = array<i32>} : memref<1x8x128xf32, #tpu.memory_space<vmem>>, vector<1x8x128xf32>,
      %c0_i32_8 = arith.constant 0 : i32
      %c0_i32_9 = arith.constant 0 : i32
      %c0_i32_10 = arith.constant 0 : i32
      %20 = tpu.memref_slice %arg1[%c0_i32_9, %c0_i32_10] : memref<8x128xf32, #tpu.memory_space<any>> -> memref<8x128xf32, #tpu.memory_space<any>>
      %c0_i32_11 = arith.constant 0 : i32
      %c0_i32_12 = arith.constant 0 : i32
      %21 = tpu.memref_slice %arg8[%c0_i32_11, %c0_i32_12] : memref<4096x128xf32, #tpu.memory_space<vmem>> -> memref<8x128xf32, #tpu.memory_space<vmem>>
      %22 = tpu.memref_slice %arg10[%c0_i32_8] : memref<2x!tpu.dma_semaphore, #tpu.memory_space<semaphore_mem>> -> memref<1x!tpu.dma_semaphore, #tpu.memory_space<semaphore_mem>>
      %23 = tpu.memref_squeeze %22 : memref<1x!tpu.dma_semaphore, #tpu.memory_space<semaphore_mem>> -> memref<!tpu.dma_semaphore, #tpu.memory_space<semaphore_mem>>
      tpu.enqueue_dma source(%20 : memref<8x128xf32, #tpu.memory_space<any>>) target(%21 : memref<8x128xf32, #tpu.memory_space<vmem>>) target_semaphore(%23 : memref<!tpu.dma_semaphore, #tpu.memory_space<semaphore_mem>>)
      %c0_i32_13 = arith.constant 0 : i32
      %c0_i32_14 = arith.constant 0 : i32
      %c0_i32_15 = arith.constant 0 : i32
      %24 = tpu.memref_slice %arg1[%c0_i32_14, %c0_i32_15] : memref<8x128xf32, #tpu.memory_space<any>> -> memref<8x128xf32, #tpu.memory_space<any>>
      %c0_i32_16 = arith.constant 0 : i32
      %c0_i32_17 = arith.constant 0 : i32
      %25 = tpu.memref_slice %arg8[%c0_i32_16, %c0_i32_17] : memref<4096x128xf32, #tpu.memory_space<vmem>> -> memref<8x128xf32, #tpu.memory_space<vmem>>
      %26 = tpu.memref_slice %arg10[%c0_i32_13] : memref<2x!tpu.dma_semaphore, #tpu.memory_space<semaphore_mem>> -> memref<1x!tpu.dma_semaphore, #tpu.memory_space<semaphore_mem>>
      %27 = tpu.memref_squeeze %26 : memref<1x!tpu.dma_semaphore, #tpu.memory_space<semaphore_mem>> -> memref<!tpu.dma_semaphore, #tpu.memory_space<semaphore_mem>>
      tpu.wait_dma2 semaphore(%27 : memref<!tpu.dma_semaphore, #tpu.memory_space<semaphore_mem>>) src(%24 : memref<8x128xf32, #tpu.memory_space<any>>) dst(%25 : memref<8x128xf32, #tpu.memory_space<vmem>>)
      %c0_18 = arith.constant 0 : index
      %c0_19 = arith.constant 0 : index
      %28 = vector.load %arg8[%c0_18, %c0_19] : memref<4096x128xf32, #tpu.memory_space<vmem>>, vector<8x128xf32>
      %c0_20 = arith.constant 0 : index
      %c0_21 = arith.constant 0 : index
      %c0_22 = arith.constant 0 : index
      %29 = vector.load %arg7[%c0_20, %c0_21, %c0_22] : memref<1x8x128xf32, #tpu.memory_space<vmem>>, vector<1x8x128xf32>
      %30 = arith.mulf %28, %28 : vector<8x128xf32>
      %31 = vector.shape_cast %30 : vector<8x128xf32> to vector<1x8x128xf32>
      %cst_23 = arith.constant dense<0.000000e+00> : vector<8x128xf32>
      %32 = vector.multi_reduction <add>, %31, %cst_23 [0] : vector<1x8x128xf32> to vector<8x128xf32>
      %33 = vector.shape_cast %32 : vector<8x128xf32> to vector<1x8x128xf32>
      %34 = arith.addf %29, %33 : vector<1x8x128xf32>
      %c0_24 = arith.constant 0 : index
      %c0_25 = arith.constant 0 : index
      %c0_26 = arith.constant 0 : index
      %35 = vector.load %arg7[%c0_24, %c0_25, %c0_26] : memref<1x8x128xf32, #tpu.memory_space<vmem>>, vector<1x8x128xf32>
      tpu.vector_store %arg7[%c0_24, %c0_25, %c0_26], %34 {strides = array<i32>} : memref<1x8x128xf32, #tpu.memory_space<vmem>>, vector<1x8x128xf32>,
    } else {
    }
    %c1_i32 = arith.constant 1 : i32
    %3 = arith.cmpi eq, %arg0, %c1_i32 : i32
    %4 = arith.extui %3 : i1 to i32
    %c0_i32_1 = arith.constant 0 : i32
    %5 = arith.cmpi ne, %4, %c0_i32_1 : i32
    scf.if %5 {
      %cst = arith.constant 0.000000e+00 : f32
      %18 = vector.broadcast %cst : f32 to vector<1x8x128xf32>
      %c0 = arith.constant 0 : index
      %c0_6 = arith.constant 0 : index
      %c0_7 = arith.constant 0 : index
      %19 = vector.load %arg7[%c0, %c0_6, %c0_7] : memref<1x8x128xf32, #tpu.memory_space<vmem>>, vector<1x8x128xf32>
      tpu.vector_store %arg7[%c0, %c0_6, %c0_7], %18 {strides = array<i32>} : memref<1x8x128xf32, #tpu.memory_space<vmem>>, vector<1x8x128xf32>,
      %c0_i32_8 = arith.constant 0 : i32
      %c0_i32_9 = arith.constant 0 : i32
      %c0_i32_10 = arith.constant 0 : i32
      %20 = tpu.memref_slice %arg2[%c0_i32_9, %c0_i32_10] : memref<8x128xf32, #tpu.memory_space<any>> -> memref<8x128xf32, #tpu.memory_space<any>>
      %c0_i32_11 = arith.constant 0 : i32
      %c0_i32_12 = arith.constant 0 : i32
      %21 = tpu.memref_slice %arg8[%c0_i32_11, %c0_i32_12] : memref<4096x128xf32, #tpu.memory_space<vmem>> -> memref<8x128xf32, #tpu.memory_space<vmem>>
      %22 = tpu.memref_slice %arg10[%c0_i32_8] : memref<2x!tpu.dma_semaphore, #tpu.memory_space<semaphore_mem>> -> memref<1x!tpu.dma_semaphore, #tpu.memory_space<semaphore_mem>>
      %23 = tpu.memref_squeeze %22 : memref<1x!tpu.dma_semaphore, #tpu.memory_space<semaphore_mem>> -> memref<!tpu.dma_semaphore, #tpu.memory_space<semaphore_mem>>
      tpu.enqueue_dma source(%20 : memref<8x128xf32, #tpu.memory_space<any>>) target(%21 : memref<8x128xf32, #tpu.memory_space<vmem>>) target_semaphore(%23 : memref<!tpu.dma_semaphore, #tpu.memory_space<semaphore_mem>>)
      %c0_i32_13 = arith.constant 0 : i32
      %c0_i32_14 = arith.constant 0 : i32
      %c0_i32_15 = arith.constant 0 : i32
      %24 = tpu.memref_slice %arg2[%c0_i32_14, %c0_i32_15] : memref<8x128xf32, #tpu.memory_space<any>> -> memref<8x128xf32, #tpu.memory_space<any>>
      %c0_i32_16 = arith.constant 0 : i32
      %c0_i32_17 = arith.constant 0 : i32
      %25 = tpu.memref_slice %arg8[%c0_i32_16, %c0_i32_17] : memref<4096x128xf32, #tpu.memory_space<vmem>> -> memref<8x128xf32, #tpu.memory_space<vmem>>
      %26 = tpu.memref_slice %arg10[%c0_i32_13] : memref<2x!tpu.dma_semaphore, #tpu.memory_space<semaphore_mem>> -> memref<1x!tpu.dma_semaphore, #tpu.memory_space<semaphore_mem>>
      %27 = tpu.memref_squeeze %26 : memref<1x!tpu.dma_semaphore, #tpu.memory_space<semaphore_mem>> -> memref<!tpu.dma_semaphore, #tpu.memory_space<semaphore_mem>>
      tpu.wait_dma2 semaphore(%27 : memref<!tpu.dma_semaphore, #tpu.memory_space<semaphore_mem>>) src(%24 : memref<8x128xf32, #tpu.memory_space<any>>) dst(%25 : memref<8x128xf32, #tpu.memory_space<vmem>>)
      %c0_18 = arith.constant 0 : index
      %c0_19 = arith.constant 0 : index
      %28 = vector.load %arg8[%c0_18, %c0_19] : memref<4096x128xf32, #tpu.memory_space<vmem>>, vector<8x128xf32>
      %c0_20 = arith.constant 0 : index
      %c0_21 = arith.constant 0 : index
      %c0_22 = arith.constant 0 : index
      %29 = vector.load %arg7[%c0_20, %c0_21, %c0_22] : memref<1x8x128xf32, #tpu.memory_space<vmem>>, vector<1x8x128xf32>
      %30 = arith.mulf %28, %28 : vector<8x128xf32>
      %31 = vector.shape_cast %30 : vector<8x128xf32> to vector<1x8x128xf32>
      %cst_23 = arith.constant dense<0.000000e+00> : vector<8x128xf32>
      %32 = vector.multi_reduction <add>, %31, %cst_23 [0] : vector<1x8x128xf32> to vector<8x128xf32>
      %33 = vector.shape_cast %32 : vector<8x128xf32> to vector<1x8x128xf32>
      %34 = arith.addf %29, %33 : vector<1x8x128xf32>
      %c0_24 = arith.constant 0 : index
      %c0_25 = arith.constant 0 : index
      %c0_26 = arith.constant 0 : index
      %35 = vector.load %arg7[%c0_24, %c0_25, %c0_26] : memref<1x8x128xf32, #tpu.memory_space<vmem>>, vector<1x8x128xf32>
      tpu.vector_store %arg7[%c0_24, %c0_25, %c0_26], %34 {strides = array<i32>} : memref<1x8x128xf32, #tpu.memory_space<vmem>>, vector<1x8x128xf32>,
    } else {
    }
    %c2_i32 = arith.constant 2 : i32
    %6 = arith.cmpi eq, %arg0, %c2_i32 : i32
    %7 = arith.extui %6 : i1 to i32
    %c0_i32_2 = arith.constant 0 : i32
    %8 = arith.cmpi ne, %7, %c0_i32_2 : i32
    scf.if %8 {
      %cst = arith.constant 0.000000e+00 : f32
      %18 = vector.broadcast %cst : f32 to vector<1x8x128xf32>
      %c0 = arith.constant 0 : index
      %c0_6 = arith.constant 0 : index
      %c0_7 = arith.constant 0 : index
      %19 = vector.load %arg7[%c0, %c0_6, %c0_7] : memref<1x8x128xf32, #tpu.memory_space<vmem>>, vector<1x8x128xf32>
      tpu.vector_store %arg7[%c0, %c0_6, %c0_7], %18 {strides = array<i32>} : memref<1x8x128xf32, #tpu.memory_space<vmem>>, vector<1x8x128xf32>,
      %c0_i32_8 = arith.constant 0 : i32
      %c0_i32_9 = arith.constant 0 : i32
      %c0_i32_10 = arith.constant 0 : i32
      %20 = tpu.memref_slice %arg3[%c0_i32_9, %c0_i32_10] : memref<8x128xf32, #tpu.memory_space<any>> -> memref<8x128xf32, #tpu.memory_space<any>>
      %c0_i32_11 = arith.constant 0 : i32
      %c0_i32_12 = arith.constant 0 : i32
      %21 = tpu.memref_slice %arg8[%c0_i32_11, %c0_i32_12] : memref<4096x128xf32, #tpu.memory_space<vmem>> -> memref<8x128xf32, #tpu.memory_space<vmem>>
      %22 = tpu.memref_slice %arg10[%c0_i32_8] : memref<2x!tpu.dma_semaphore, #tpu.memory_space<semaphore_mem>> -> memref<1x!tpu.dma_semaphore, #tpu.memory_space<semaphore_mem>>
      %23 = tpu.memref_squeeze %22 : memref<1x!tpu.dma_semaphore, #tpu.memory_space<semaphore_mem>> -> memref<!tpu.dma_semaphore, #tpu.memory_space<semaphore_mem>>
      tpu.enqueue_dma source(%20 : memref<8x128xf32, #tpu.memory_space<any>>) target(%21 : memref<8x128xf32, #tpu.memory_space<vmem>>) target_semaphore(%23 : memref<!tpu.dma_semaphore, #tpu.memory_space<semaphore_mem>>)
      %c0_i32_13 = arith.constant 0 : i32
      %c0_i32_14 = arith.constant 0 : i32
      %c0_i32_15 = arith.constant 0 : i32
      %24 = tpu.memref_slice %arg3[%c0_i32_14, %c0_i32_15] : memref<8x128xf32, #tpu.memory_space<any>> -> memref<8x128xf32, #tpu.memory_space<any>>
      %c0_i32_16 = arith.constant 0 : i32
      %c0_i32_17 = arith.constant 0 : i32
      %25 = tpu.memref_slice %arg8[%c0_i32_16, %c0_i32_17] : memref<4096x128xf32, #tpu.memory_space<vmem>> -> memref<8x128xf32, #tpu.memory_space<vmem>>
      %26 = tpu.memref_slice %arg10[%c0_i32_13] : memref<2x!tpu.dma_semaphore, #tpu.memory_space<semaphore_mem>> -> memref<1x!tpu.dma_semaphore, #tpu.memory_space<semaphore_mem>>
      %27 = tpu.memref_squeeze %26 : memref<1x!tpu.dma_semaphore, #tpu.memory_space<semaphore_mem>> -> memref<!tpu.dma_semaphore, #tpu.memory_space<semaphore_mem>>
      tpu.wait_dma2 semaphore(%27 : memref<!tpu.dma_semaphore, #tpu.memory_space<semaphore_mem>>) src(%24 : memref<8x128xf32, #tpu.memory_space<any>>) dst(%25 : memref<8x128xf32, #tpu.memory_space<vmem>>)
      %c0_18 = arith.constant 0 : index
      %c0_19 = arith.constant 0 : index
      %28 = vector.load %arg8[%c0_18, %c0_19] : memref<4096x128xf32, #tpu.memory_space<vmem>>, vector<8x128xf32>
      %c0_20 = arith.constant 0 : index
      %c0_21 = arith.constant 0 : index
      %c0_22 = arith.constant 0 : index
      %29 = vector.load %arg7[%c0_20, %c0_21, %c0_22] : memref<1x8x128xf32, #tpu.memory_space<vmem>>, vector<1x8x128xf32>
      %30 = arith.mulf %28, %28 : vector<8x128xf32>
      %31 = vector.shape_cast %30 : vector<8x128xf32> to vector<1x8x128xf32>
      %cst_23 = arith.constant dense<0.000000e+00> : vector<8x128xf32>
      %32 = vector.multi_reduction <add>, %31, %cst_23 [0] : vector<1x8x128xf32> to vector<8x128xf32>
      %33 = vector.shape_cast %32 : vector<8x128xf32> to vector<1x8x128xf32>
      %34 = arith.addf %29, %33 : vector<1x8x128xf32>
      %c0_24 = arith.constant 0 : index
      %c0_25 = arith.constant 0 : index
      %c0_26 = arith.constant 0 : index
      %35 = vector.load %arg7[%c0_24, %c0_25, %c0_26] : memref<1x8x128xf32, #tpu.memory_space<vmem>>, vector<1x8x128xf32>
      tpu.vector_store %arg7[%c0_24, %c0_25, %c0_26], %34 {strides = array<i32>} : memref<1x8x128xf32, #tpu.memory_space<vmem>>, vector<1x8x128xf32>,
    } else {
    }
    %c3_i32 = arith.constant 3 : i32
    %9 = arith.cmpi eq, %arg0, %c3_i32 : i32
    %10 = arith.extui %9 : i1 to i32
    %c0_i32_3 = arith.constant 0 : i32
    %11 = arith.cmpi ne, %10, %c0_i32_3 : i32
    scf.if %11 {
      %cst = arith.constant 0.000000e+00 : f32
      %18 = vector.broadcast %cst : f32 to vector<1x8x128xf32>
      %c0 = arith.constant 0 : index
      %c0_6 = arith.constant 0 : index
      %c0_7 = arith.constant 0 : index
      %19 = vector.load %arg7[%c0, %c0_6, %c0_7] : memref<1x8x128xf32, #tpu.memory_space<vmem>>, vector<1x8x128xf32>
      tpu.vector_store %arg7[%c0, %c0_6, %c0_7], %18 {strides = array<i32>} : memref<1x8x128xf32, #tpu.memory_space<vmem>>, vector<1x8x128xf32>,
      %c0_i32_8 = arith.constant 0 : i32
      %c0_i32_9 = arith.constant 0 : i32
      %c0_i32_10 = arith.constant 0 : i32
      %20 = tpu.memref_slice %arg4[%c0_i32_9, %c0_i32_10] : memref<16x128xbf16, #tpu.memory_space<any>> -> memref<16x128xbf16, #tpu.memory_space<any>>
      %c0_i32_11 = arith.constant 0 : i32
      %c0_i32_12 = arith.constant 0 : i32
      %21 = tpu.memref_slice %arg9[%c0_i32_11, %c0_i32_12] : memref<4096x128xbf16, #tpu.memory_space<vmem>> -> memref<16x128xbf16, #tpu.memory_space<vmem>>
      %22 = tpu.memref_slice %arg10[%c0_i32_8] : memref<2x!tpu.dma_semaphore, #tpu.memory_space<semaphore_mem>> -> memref<1x!tpu.dma_semaphore, #tpu.memory_space<semaphore_mem>>
      %23 = tpu.memref_squeeze %22 : memref<1x!tpu.dma_semaphore, #tpu.memory_space<semaphore_mem>> -> memref<!tpu.dma_semaphore, #tpu.memory_space<semaphore_mem>>
      tpu.enqueue_dma source(%20 : memref<16x128xbf16, #tpu.memory_space<any>>) target(%21 : memref<16x128xbf16, #tpu.memory_space<vmem>>) target_semaphore(%23 : memref<!tpu.dma_semaphore, #tpu.memory_space<semaphore_mem>>)
      %c0_i32_13 = arith.constant 0 : i32
      %c0_i32_14 = arith.constant 0 : i32
      %c0_i32_15 = arith.constant 0 : i32
      %24 = tpu.memref_slice %arg4[%c0_i32_14, %c0_i32_15] : memref<16x128xbf16, #tpu.memory_space<any>> -> memref<16x128xbf16, #tpu.memory_space<any>>
      %c0_i32_16 = arith.constant 0 : i32
      %c0_i32_17 = arith.constant 0 : i32
      %25 = tpu.memref_slice %arg9[%c0_i32_16, %c0_i32_17] : memref<4096x128xbf16, #tpu.memory_space<vmem>> -> memref<16x128xbf16, #tpu.memory_space<vmem>>
      %26 = tpu.memref_slice %arg10[%c0_i32_13] : memref<2x!tpu.dma_semaphore, #tpu.memory_space<semaphore_mem>> -> memref<1x!tpu.dma_semaphore, #tpu.memory_space<semaphore_mem>>
      %27 = tpu.memref_squeeze %26 : memref<1x!tpu.dma_semaphore, #tpu.memory_space<semaphore_mem>> -> memref<!tpu.dma_semaphore, #tpu.memory_space<semaphore_mem>>
      tpu.wait_dma2 semaphore(%27 : memref<!tpu.dma_semaphore, #tpu.memory_space<semaphore_mem>>) src(%24 : memref<16x128xbf16, #tpu.memory_space<any>>) dst(%25 : memref<16x128xbf16, #tpu.memory_space<vmem>>)
      %c0_18 = arith.constant 0 : index
      %c0_19 = arith.constant 0 : index
      %28 = vector.load %arg9[%c0_18, %c0_19] : memref<4096x128xbf16, #tpu.memory_space<vmem>>, vector<16x128xbf16>
      %c0_20 = arith.constant 0 : index
      %c0_21 = arith.constant 0 : index
      %c0_22 = arith.constant 0 : index
      %29 = vector.load %arg7[%c0_20, %c0_21, %c0_22] : memref<1x8x128xf32, #tpu.memory_space<vmem>>, vector<1x8x128xf32>
      %30 = arith.extf %28 : vector<16x128xbf16> to vector<16x128xf32>
      %31 = arith.mulf %30, %30 : vector<16x128xf32>
      %32 = vector.shape_cast %31 : vector<16x128xf32> to vector<2x8x128xf32>
      %cst_23 = arith.constant dense<0.000000e+00> : vector<8x128xf32>
      %33 = vector.multi_reduction <add>, %32, %cst_23 [0] : vector<2x8x128xf32> to vector<8x128xf32>
      %34 = vector.shape_cast %33 : vector<8x128xf32> to vector<1x8x128xf32>
      %35 = arith.addf %29, %34 : vector<1x8x128xf32>
      %c0_24 = arith.constant 0 : index
      %c0_25 = arith.constant 0 : index
      %c0_26 = arith.constant 0 : index
      %36 = vector.load %arg7[%c0_24, %c0_25, %c0_26] : memref<1x8x128xf32, #tpu.memory_space<vmem>>, vector<1x8x128xf32>
      tpu.vector_store %arg7[%c0_24, %c0_25, %c0_26], %35 {strides = array<i32>} : memref<1x8x128xf32, #tpu.memory_space<vmem>>, vector<1x8x128xf32>,
    } else {
    }
    %c4_i32 = arith.constant 4 : i32
    %12 = arith.cmpi eq, %arg0, %c4_i32 : i32
    %13 = arith.extui %12 : i1 to i32
    %c0_i32_4 = arith.constant 0 : i32
    %14 = arith.cmpi ne, %13, %c0_i32_4 : i32
    scf.if %14 {
      %cst = arith.constant 0.000000e+00 : f32
      %18 = vector.broadcast %cst : f32 to vector<1x8x128xf32>
      %c0 = arith.constant 0 : index
      %c0_6 = arith.constant 0 : index
      %c0_7 = arith.constant 0 : index
      %19 = vector.load %arg7[%c0, %c0_6, %c0_7] : memref<1x8x128xf32, #tpu.memory_space<vmem>>, vector<1x8x128xf32>
      tpu.vector_store %arg7[%c0, %c0_6, %c0_7], %18 {strides = array<i32>} : memref<1x8x128xf32, #tpu.memory_space<vmem>>, vector<1x8x128xf32>,
      %c0_i32_8 = arith.constant 0 : i32
      %c0_i32_9 = arith.constant 0 : i32
      %c0_i32_10 = arith.constant 0 : i32
      %20 = tpu.memref_slice %arg5[%c0_i32_9, %c0_i32_10] : memref<64x128xf32, #tpu.memory_space<any>> -> memref<64x128xf32, #tpu.memory_space<any>>
      %c0_i32_11 = arith.constant 0 : i32
      %c0_i32_12 = arith.constant 0 : i32
      %21 = tpu.memref_slice %arg8[%c0_i32_11, %c0_i32_12] : memref<4096x128xf32, #tpu.memory_space<vmem>> -> memref<64x128xf32, #tpu.memory_space<vmem>>
      %22 = tpu.memref_slice %arg10[%c0_i32_8] : memref<2x!tpu.dma_semaphore, #tpu.memory_space<semaphore_mem>> -> memref<1x!tpu.dma_semaphore, #tpu.memory_space<semaphore_mem>>
      %23 = tpu.memref_squeeze %22 : memref<1x!tpu.dma_semaphore, #tpu.memory_space<semaphore_mem>> -> memref<!tpu.dma_semaphore, #tpu.memory_space<semaphore_mem>>
      tpu.enqueue_dma source(%20 : memref<64x128xf32, #tpu.memory_space<any>>) target(%21 : memref<64x128xf32, #tpu.memory_space<vmem>>) target_semaphore(%23 : memref<!tpu.dma_semaphore, #tpu.memory_space<semaphore_mem>>)
      %c0_i32_13 = arith.constant 0 : i32
      %c0_i32_14 = arith.constant 0 : i32
      %c0_i32_15 = arith.constant 0 : i32
      %24 = tpu.memref_slice %arg5[%c0_i32_14, %c0_i32_15] : memref<64x128xf32, #tpu.memory_space<any>> -> memref<64x128xf32, #tpu.memory_space<any>>
      %c0_i32_16 = arith.constant 0 : i32
      %c0_i32_17 = arith.constant 0 : i32
      %25 = tpu.memref_slice %arg8[%c0_i32_16, %c0_i32_17] : memref<4096x128xf32, #tpu.memory_space<vmem>> -> memref<64x128xf32, #tpu.memory_space<vmem>>
      %26 = tpu.memref_slice %arg10[%c0_i32_13] : memref<2x!tpu.dma_semaphore, #tpu.memory_space<semaphore_mem>> -> memref<1x!tpu.dma_semaphore, #tpu.memory_space<semaphore_mem>>
      %27 = tpu.memref_squeeze %26 : memref<1x!tpu.dma_semaphore, #tpu.memory_space<semaphore_mem>> -> memref<!tpu.dma_semaphore, #tpu.memory_space<semaphore_mem>>
      tpu.wait_dma2 semaphore(%27 : memref<!tpu.dma_semaphore, #tpu.memory_space<semaphore_mem>>) src(%24 : memref<64x128xf32, #tpu.memory_space<any>>) dst(%25 : memref<64x128xf32, #tpu.memory_space<vmem>>)
      %c0_18 = arith.constant 0 : index
      %c0_19 = arith.constant 0 : index
      %28 = vector.load %arg8[%c0_18, %c0_19] : memref<4096x128xf32, #tpu.memory_space<vmem>>, vector<64x128xf32>
      %c0_20 = arith.constant 0 : index
      %c0_21 = arith.constant 0 : index
      %c0_22 = arith.constant 0 : index
      %29 = vector.load %arg7[%c0_20, %c0_21, %c0_22] : memref<1x8x128xf32, #tpu.memory_space<vmem>>, vector<1x8x128xf32>
      %30 = arith.mulf %28, %28 : vector<64x128xf32>
      %31 = vector.shape_cast %30 : vector<64x128xf32> to vector<8x8x128xf32>
      %cst_23 = arith.constant dense<0.000000e+00> : vector<8x128xf32>
      %32 = vector.multi_reduction <add>, %31, %cst_23 [0] : vector<8x8x128xf32> to vector<8x128xf32>
      %33 = vector.shape_cast %32 : vector<8x128xf32> to vector<1x8x128xf32>
      %34 = arith.addf %29, %33 : vector<1x8x128xf32>
      %c0_24 = arith.constant 0 : index
      %c0_25 = arith.constant 0 : index
      %c0_26 = arith.constant 0 : index
      %35 = vector.load %arg7[%c0_24, %c0_25, %c0_26] : memref<1x8x128xf32, #tpu.memory_space<vmem>>, vector<1x8x128xf32>
      tpu.vector_store %arg7[%c0_24, %c0_25, %c0_26], %34 {strides = array<i32>} : memref<1x8x128xf32, #tpu.memory_space<vmem>>, vector<1x8x128xf32>,
    } else {
    }
    %c5_i32 = arith.constant 5 : i32
    %15 = arith.cmpi eq, %arg0, %c5_i32 : i32
    %16 = arith.extui %15 : i1 to i32
    %c0_i32_5 = arith.constant 0 : i32
    %17 = arith.cmpi ne, %16, %c0_i32_5 : i32
    scf.if %17 {
      %cst = arith.constant 0.000000e+00 : f32
      %18 = vector.broadcast %cst : f32 to vector<1x8x128xf32>
      %c0 = arith.constant 0 : index
      %c0_6 = arith.constant 0 : index
      %c0_7 = arith.constant 0 : index
      %19 = vector.load %arg7[%c0, %c0_6, %c0_7] : memref<1x8x128xf32, #tpu.memory_space<vmem>>, vector<1x8x128xf32>
      tpu.vector_store %arg7[%c0, %c0_6, %c0_7], %18 {strides = array<i32>} : memref<1x8x128xf32, #tpu.memory_space<vmem>>, vector<1x8x128xf32>,
      %c0_i32_8 = arith.constant 0 : i32
      %c0_i32_9 = arith.constant 0 : i32
      %c0_i32_10 = arith.constant 0 : i32
      %20 = tpu.memref_slice %arg6[%c0_i32_9, %c0_i32_10] : memref<72x128xf32, #tpu.memory_space<any>> -> memref<72x128xf32, #tpu.memory_space<any>>
      %c0_i32_11 = arith.constant 0 : i32
      %c0_i32_12 = arith.constant 0 : i32
      %21 = tpu.memref_slice %arg8[%c0_i32_11, %c0_i32_12] : memref<4096x128xf32, #tpu.memory_space<vmem>> -> memref<72x128xf32, #tpu.memory_space<vmem>>
      %22 = tpu.memref_slice %arg10[%c0_i32_8] : memref<2x!tpu.dma_semaphore, #tpu.memory_space<semaphore_mem>> -> memref<1x!tpu.dma_semaphore, #tpu.memory_space<semaphore_mem>>
      %23 = tpu.memref_squeeze %22 : memref<1x!tpu.dma_semaphore, #tpu.memory_space<semaphore_mem>> -> memref<!tpu.dma_semaphore, #tpu.memory_space<semaphore_mem>>
      tpu.enqueue_dma source(%20 : memref<72x128xf32, #tpu.memory_space<any>>) target(%21 : memref<72x128xf32, #tpu.memory_space<vmem>>) target_semaphore(%23 : memref<!tpu.dma_semaphore, #tpu.memory_space<semaphore_mem>>)
      %c0_i32_13 = arith.constant 0 : i32
      %c0_i32_14 = arith.constant 0 : i32
      %c0_i32_15 = arith.constant 0 : i32
      %24 = tpu.memref_slice %arg6[%c0_i32_14, %c0_i32_15] : memref<72x128xf32, #tpu.memory_space<any>> -> memref<72x128xf32, #tpu.memory_space<any>>
      %c0_i32_16 = arith.constant 0 : i32
      %c0_i32_17 = arith.constant 0 : i32
      %25 = tpu.memref_slice %arg8[%c0_i32_16, %c0_i32_17] : memref<4096x128xf32, #tpu.memory_space<vmem>> -> memref<72x128xf32, #tpu.memory_space<vmem>>
      %26 = tpu.memref_slice %arg10[%c0_i32_13] : memref<2x!tpu.dma_semaphore, #tpu.memory_space<semaphore_mem>> -> memref<1x!tpu.dma_semaphore, #tpu.memory_space<semaphore_mem>>
      %27 = tpu.memref_squeeze %26 : memref<1x!tpu.dma_semaphore, #tpu.memory_space<semaphore_mem>> -> memref<!tpu.dma_semaphore, #tpu.memory_space<semaphore_mem>>
      tpu.wait_dma2 semaphore(%27 : memref<!tpu.dma_semaphore, #tpu.memory_space<semaphore_mem>>) src(%24 : memref<72x128xf32, #tpu.memory_space<any>>) dst(%25 : memref<72x128xf32, #tpu.memory_space<vmem>>)
      %c0_18 = arith.constant 0 : index
      %c0_19 = arith.constant 0 : index
      %28 = vector.load %arg8[%c0_18, %c0_19] : memref<4096x128xf32, #tpu.memory_space<vmem>>, vector<72x128xf32>
      %c0_20 = arith.constant 0 : index
      %c0_21 = arith.constant 0 : index
      %c0_22 = arith.constant 0 : index
      %29 = vector.load %arg7[%c0_20, %c0_21, %c0_22] : memref<1x8x128xf32, #tpu.memory_space<vmem>>, vector<1x8x128xf32>
      %30 = arith.mulf %28, %28 : vector<72x128xf32>
      %31 = vector.shape_cast %30 : vector<72x128xf32> to vector<9x8x128xf32>
      %cst_23 = arith.constant dense<0.000000e+00> : vector<8x128xf32>
      %32 = vector.multi_reduction <add>, %31, %cst_23 [0] : vector<9x8x128xf32> to vector<8x128xf32>
      %33 = vector.shape_cast %32 : vector<8x128xf32> to vector<1x8x128xf32>
      %34 = arith.addf %29, %33 : vector<1x8x128xf32>
      %c0_24 = arith.constant 0 : index
      %c0_25 = arith.constant 0 : index
      %c0_26 = arith.constant 0 : index
      %35 = vector.load %arg7[%c0_24, %c0_25, %c0_26] : memref<1x8x128xf32, #tpu.memory_space<vmem>>, vector<1x8x128xf32>
      tpu.vector_store %arg7[%c0_24, %c0_25, %c0_26], %34 {strides = array<i32>} : memref<1x8x128xf32, #tpu.memory_space<vmem>>, vector<1x8x128xf32>,
    } else {
    }
    return
  }
  func.func @transform_6(%arg0: i32) -> (i32, i32, i32) {
    %c0_i32 = arith.constant 0 : i32
    %c0_i32_0 = arith.constant 0 : i32
    %c0_i32_1 = arith.constant 0 : i32
    return %arg0, %c0_i32, %c0_i32_0 : i32, i32, i32
  }
}

</mosaic_0001>

<bundles_post_ra>
// kernel: tpu_custom_call.1
= control target key start
LH: loop header
LB: loop body
LE: loop exit
PB: predicated region body
PF: predicated region fallthrough
CT: control target
= control target key end

     0   :  { %11 = vsyncpa [#allocation6], 0  ;;  %s810_s0 = inlined_call_operand.hbm [shape: f32[8,128], index: 0, kind: input, shape index: {}]   ;;  %s811_s1 = inlined_call_operand.hbm [shape: f32[8,128], index: 1, kind: input, shape index: {}]   ;;  %s812_s2 = inlined_call_operand.hbm [shape: f32[8,128], index: 2, kind: input, shape index: {}]   ;;  %s813_s3 = inlined_call_operand.vmem [shape: bf16[16,128], index: 3, kind: input, shape index: {}]   ;;  %s814_s4 = inlined_call_operand.hbm [shape: f32[64,128], index: 4, kind: input, shape index: {}]   ;;  %s815_s5 = inlined_call_operand.hbm [shape: f32[72,128], index: 5, kind: input, shape index: {}]   ;;  %s816_s6 = inlined_call_operand.hbm [shape: f32[6,8,128], index: 6, kind: output, shape index: {}]  }
   0x1   :  { %13 = vsyncpa [#allocation6 + $0x1], 0  ;;  %s641_s21 = smov 0   ;;  %s643_s22 = smov 0  }
   0x2   :  { %s645_s23 = smov 0  }
   0x3 LB: > { %s358_s24 = sadd.s32 4294967295, %s592_s23   ;;  %s658_s25 = sadd.s32 1, %s592_s23   ;;  %s592_s23 = sphi %s645_s23, %s821_s23   ;;  %s588_s22 = sphi %s643_s22, %s820_s22   ;;  %s584_s21 = sphi %s641_s21, %s819_s21  }
   0x4   : > { %s22_s26 = ssub.s32 %s592_s23, %s658_s25  ;;  %s25_s27 = sadd.s32 1, %s588_s22 }
   0x5   : > { %p23_p0 = scmp.eq.s32.totalorder %s22_s26, 0  ;;  %p359_p1 = scmp.ne.s32.totalorder %s22_s26, 0 }
   0x6   : > { %p29_p2 = scmp.eq.s32.totalorder %s592_s23, 5  ;;  %p34_p3 = scmp.ne.s32.totalorder %s588_s22, %s584_s21 }
   0x7   : > { %s667_s28 = scalar_select %p23_p0, %s588_s22, %s25_s27  }
   0x8   : > { %p669_p4 = por %p359_p1, %p29_p2  ;;  %p35_p5 = scmp.eq.s32.totalorder %s358_s24, 5 }
   0x9   : > { %p360_p7 = scmp.ge.s32.totalorder %s592_s23, 6 }
   0xa   : > { %p673_p6 = por %p35_p5, %p34_p3  ;;  %s49_s7 = sand.u32 (!%p360_p7), 1, %s588_s22  }
   0xb   : > { %44 = sbr.rel (%p360_p7) target bundleno = 225 (0xe1), region = 12  ;;  %s361_s8 = sshll.u32 (!%p360_p7), %s49_s7, 3 }
   0xc   : > { %s681_s9 = scalar_lea.vmem (!%p360_p7), [#allocation5], %s361_s8  ;;  %p362_p8 = scmp.ne.s32.totalorder (!%p360_p7), %s592_s23, 0 }
  0x12   : > { %55 = sbr.rel (%p362_p8) target bundleno = 43 (0x2b), region = 16  ;;  %v594_v0 = vmov (!%p362_p8), 0.0   ;;  %s595_s10 = smov (!%p362_p8), [#allocation2]  }
  0x13   : > { %56 = vst [vmem:[%s681_s9] sm:$0xff] (!%p362_p8), %v594_v0  ;;  %s64_s11 = sshll.u32 (!%p362_p8), %s595_s10, 4  ;;  %s416_s14 = scalar_lea.hbm (!%p362_p8), %s810_s0, 128  ;;  %s65_s11 = int_to_ptr.vmem [resolvable:$true] %s64_s11 }
  0x14   : > { %p417_p9 = scmp.ne.s32.totalorder (!%p362_p8), %s810_s0, %s416_s14  ;;  %p420_p10 = scmp.lt.u32.totalorder (!%p362_p8), %s416_s14, %s810_s0 }
  0x16   : > { %p422_p11 = pnand (!%p362_p8), %p420_p10, %p417_p9 }
  0x19   : > { %425 = shalt.err (!%p422_p11)  }
  0x1a   : > { %s426_s19 = scalar_lea.vmem %s65_s11, 128  ;;  %s430_s20 = scalar_lea.vmem %s65_s11, 65536 }
  0x1b   : > { %p427_p12 = scmp.ne.s32.totalorder %s65_s11, %s426_s19  ;;  %p431_p13 = scmp.lt.s32.totalorder %s65_s11, %s65_s11 }
  0x1c   : > { %p432_p0 = scmp.lt.s32.totalorder %s430_s20, %s426_s19 }
  0x1e   : > { %p433_p1 = por %p432_p0, %p431_p13 }
  0x20   : > { %p434_p2 = pnand %p433_p1, %p427_p12 }
  0x22   : > { %437 = shalt.err (!%p434_p2)  }
  0x23   : > { %67 = dma.hbm_to_vmem [thread:$0]  %s810_s0, 128, %s65_s11, [#allocation4] }
  0x24   : > { %566 = dma.done.wait [#allocation4], 128 }
  0x25   : > { %567 = vsyncadd [#allocation4], 4294967168  ;;  %v71_v1 = vld [vmem:[#allocation2] sm:$0xff] }
  0x26   : > { %v72_v2 = vld [vmem:[%s681_s9] sm:$0xff]  ;;  %v73_v3 = vmul.f32 %v71_v1, %v71_v1 }
  0x28   : > { %v75_v4 = vadd.f32 %v73_v3, %v72_v2 }
  0x2a   : > { %76 = vst [vmem:[%s681_s9] sm:$0xff] %v75_v4 }
  0x2b PF: > { %p363_p3 = scmp.ne.s32.totalorder %s592_s23, 1 }
  0x2c   : > { %v596_v5 = vmov (!%p363_p3), 0.0   ;;  %s597_s27 = smov (!%p363_p3), [#allocation2]   ;;  %s438_s12 = scalar_lea.hbm (!%p363_p3), %s811_s1, 128 }
  0x2d   : > { %80 = sbr.rel (%p363_p3) target bundleno = 70 (0x46), region = 24  ;;  %81 = vst [vmem:[%s681_s9] sm:$0xff] (!%p363_p3), %v596_v5  ;;  %s89_s8 = sshll.u32 (!%p363_p3), %s597_s27, 4  ;;  %s90_s8 = int_to_ptr.vmem [resolvable:$true] %s89_s8 }
  0x2e   : > { %p439_p5 = scmp.ne.s32.totalorder (!%p363_p3), %s811_s1, %s438_s12  ;;  %p442_p7 = scmp.lt.u32.totalorder (!%p363_p3), %s438_s12, %s811_s1 }
  0x30   : > { %p444_p8 = pnand (!%p363_p3), %p442_p7, %p439_p5 }
  0x34   : > { %447 = shalt.err (!%p444_p8)  }
  0x35   : > { %s448_s17 = scalar_lea.vmem %s90_s8, 128  ;;  %s452_s18 = scalar_lea.vmem %s90_s8, 65536 }
  0x36   : > { %p449_p9 = scmp.ne.s32.totalorder %s90_s8, %s448_s17  ;;  %p453_p10 = scmp.lt.s32.totalorder %s90_s8, %s90_s8 }
  0x37   : > { %p454_p11 = scmp.lt.s32.totalorder %s452_s18, %s448_s17 }
  0x39   : > { %p455_p12 = por %p454_p11, %p453_p10 }
  0x3b   : > { %p456_p13 = pnand %p455_p12, %p449_p9 }
  0x3d   : > { %459 = shalt.err (!%p456_p13)  }
  0x3e   : > { %92 = dma.hbm_to_vmem [thread:$0]  %s811_s1, 128, %s90_s8, [#allocation4] }
  0x3f   : > { %568 = dma.done.wait [#allocation4], 128 }
  0x40   : > { %569 = vsyncadd [#allocation4], 4294967168  ;;  %v96_v6 = vld [vmem:[#allocation2] sm:$0xff] }
  0x41   : > { %v97_v7 = vld [vmem:[%s681_s9] sm:$0xff]  ;;  %v98_v8 = vmul.f32 %v96_v6, %v96_v6 }
  0x43   : > { %v100_v9 = vadd.f32 %v98_v8, %v97_v7 }
  0x45   : > { %101 = vst [vmem:[%s681_s9] sm:$0xff] %v100_v9 }
  0x46 PF: > { %p364_p0 = scmp.ne.s32.totalorder %s592_s23, 2 }
  0x47   : > { %v598_v10 = vmov (!%p364_p0), 0.0   ;;  %s599_s24 = smov (!%p364_p0), [#allocation2]   ;;  %s460_s10 = scalar_lea.hbm (!%p364_p0), %s812_s2, 128 }
  0x48   : > { %105 = sbr.rel (%p364_p0) target bundleno = 97 (0x61), region = 32  ;;  %106 = vst [vmem:[%s681_s9] sm:$0xff] (!%p364_p0), %v598_v10  ;;  %s114_s26 = sshll.u32 (!%p364_p0), %s599_s24, 4  ;;  %s115_s26 = int_to_ptr.vmem [resolvable:$true] %s114_s26 }
  0x49   : > { %p461_p1 = scmp.ne.s32.totalorder (!%p364_p0), %s812_s2, %s460_s10  ;;  %p464_p2 = scmp.lt.u32.totalorder (!%p364_p0), %s460_s10, %s812_s2 }
  0x4b   : > { %p466_p3 = pnand (!%p364_p0), %p464_p2, %p461_p1 }
  0x4f   : > { %469 = shalt.err (!%p466_p3)  }
  0x50   : > { %s470_s15 = scalar_lea.vmem %s115_s26, 128  ;;  %s474_s16 = scalar_lea.vmem %s115_s26, 65536 }
  0x51   : > { %p471_p5 = scmp.ne.s32.totalorder %s115_s26, %s470_s15  ;;  %p475_p7 = scmp.lt.s32.totalorder %s115_s26, %s115_s26 }
  0x52   : > { %p476_p8 = scmp.lt.s32.totalorder %s474_s16, %s470_s15 }
  0x54   : > { %p477_p9 = por %p476_p8, %p475_p7 }
  0x56   : > { %p478_p10 = pnand %p477_p9, %p471_p5 }
  0x58   : > { %481 = shalt.err (!%p478_p10)  }
  0x59   : > { %117 = dma.hbm_to_vmem [thread:$0]  %s812_s2, 128, %s115_s26, [#allocation4] }
  0x5a   : > { %570 = dma.done.wait [#allocation4], 128 }
  0x5b   : > { %571 = vsyncadd [#allocation4], 4294967168  ;;  %v121_v11 = vld [vmem:[#allocation2] sm:$0xff] }
  0x5c   : > { %v122_v12 = vld [vmem:[%s681_s9] sm:$0xff]  ;;  %v123_v13 = vmul.f32 %v121_v11, %v121_v11 }
  0x5e   : > { %v125_v14 = vadd.f32 %v123_v13, %v122_v12 }
  0x60   : > { %126 = vst [vmem:[%s681_s9] sm:$0xff] %v125_v14 }
  0x61 PF: > { %p365_p11 = scmp.ne.s32.totalorder %s592_s23, 3 }
  0x62   : > { %v164_v15 = vld [vmem:[%s813_s3] sm:$0xff] (!%p365_p11)  ;;  %v600_v16 = vmov (!%p365_p11), 0.0  }
  0x63   : > { %130 = sbr.rel (%p365_p11) target bundleno = 117 (0x75), region = 40  ;;  %131 = vst [vmem:[%s681_s9] sm:$0xff] (!%p365_p11), %v600_v16 }
  0x6a   : > { %173 = vsyncadd [#allocation4], 128 }
  0x6b   : > { %572 = dma.done.wait [#allocation4], 128 }
  0x6c   : > { %573 = vsyncadd [#allocation4], 4294967168  ;;  %v180_v17 = vunpack.c.l.bf16 %v164_v15  ;;  %v181_v18 = vunpack.c.h.bf16 %v164_v15  ;;  %v179_v22 = vld [vmem:[%s681_s9] sm:$0xff] }
  0x6e   : > { %v182_v19 = vmul.f32 %v180_v17, %v180_v17  ;;  %v183_v20 = vmul.f32 %v181_v18, %v181_v18 }
  0x70   : > { %v184_v21 = vadd.f32 %v183_v20, %v182_v19 }
  0x72   : > { %v185_v23 = vadd.f32 %v184_v21, %v179_v22 }
  0x74   : > { %186 = vst [vmem:[%s681_s9] sm:$0xff] %v185_v23 }
  0x75 PF: > { %p366_p12 = scmp.ne.s32.totalorder %s592_s23, 4 }
  0x76   : > { %v601_v24 = vmov (!%p366_p12), 0.0   ;;  %s602_s24 = smov (!%p366_p12), [#allocation2]   ;;  %s482_s10 = scalar_lea.hbm (!%p366_p12), %s814_s4, 1024 }
  0x77   : > { %190 = sbr.rel (%p366_p12) target bundleno = 158 (0x9e), region = 78  ;;  %191 = vst [vmem:[%s681_s9] sm:$0xff] (!%p366_p12), %v601_v24  ;;  %s199_s26 = sshll.u32 (!%p366_p12), %s602_s24, 4  ;;  %s200_s26 = int_to_ptr.vmem [resolvable:$true] %s199_s26 }
  0x78   : > { %p483_p13 = scmp.ne.s32.totalorder (!%p366_p12), %s814_s4, %s482_s10  ;;  %p486_p0 = scmp.lt.u32.totalorder (!%p366_p12), %s482_s10, %s814_s4 }
  0x7a   : > { %p488_p1 = pnand (!%p366_p12), %p486_p0, %p483_p13 }
  0x7e   : > { %491 = shalt.err (!%p488_p1)  }
  0x7f   : > { %s492_s15 = scalar_lea.vmem %s200_s26, 1024  ;;  %s496_s16 = scalar_lea.vmem %s200_s26, 65536 }
  0x80   : > { %p493_p2 = scmp.ne.s32.totalorder %s200_s26, %s492_s15  ;;  %p497_p3 = scmp.lt.s32.totalorder %s200_s26, %s200_s26 }
  0x81   : > { %p498_p5 = scmp.lt.s32.totalorder %s496_s16, %s492_s15 }
  0x83   : > { %p499_p7 = por %p498_p5, %p497_p3 }
  0x85   : > { %p500_p8 = pnand %p499_p7, %p493_p2 }
  0x87   : > { %503 = shalt.err (!%p500_p8)  }
  0x88   : > { %202 = dma.hbm_to_vmem [thread:$0]  %s814_s4, 1024, %s200_s26, [#allocation4] }
  0x89   : > { %574 = dma.done.wait [#allocation4], 1024 }
  0x8a   : > { %575 = vsyncadd [#allocation4], 4294966272  ;;  %v206_v25 = vld [vmem:[#allocation2] sm:$0xff]  ;;  %v207_v26 = vld [vmem:[#allocation2 + $0x8] sm:$0xff] }
  0x8b   : > { %v208_v27 = vld [vmem:[#allocation2 + $0x10] sm:$0xff]  ;;  %v209_v28 = vld [vmem:[#allocation2 + $0x18] sm:$0xff]  ;;  %v215_v29 = vmul.f32 %v206_v25, %v206_v25  ;;  %v216_v30 = vmul.f32 %v207_v26, %v207_v26  ;;  %v210_v32 = vld [vmem:[#allocation2 + $0x20] sm:$0xff] }
  0x8c   : > { %v217_v31 = vmul.f32 %v208_v27, %v208_v27  ;;  %v218_v33 = vmul.f32 %v209_v28, %v209_v28  ;;  %v211_v35 = vld [vmem:[#allocation2 + $0x28] sm:$0xff]  ;;  %v219_v36 = vmul.f32 %v210_v32, %v210_v32  ;;  %v212_v38 = vld [vmem:[#allocation2 + $0x30] sm:$0xff]  ;;  %v213_v41 = vld [vmem:[#allocation2 + $0x38] sm:$0xff] }
  0x8d   : > { %v223_v34 = vadd.f32 %v216_v30, %v215_v29  ;;  %v220_v39 = vmul.f32 %v211_v35, %v211_v35  ;;  %v221_v42 = vmul.f32 %v212_v38, %v212_v38  ;;  %v222_v44 = vmul.f32 %v213_v41, %v213_v41  ;;  %v214_v47 = vld [vmem:[%s681_s9] sm:$0xff] }
  0x8f   : > { %v224_v37 = vadd.f32 %v223_v34, %v217_v31 }
  0x91   : > { %v225_v40 = vadd.f32 %v224_v37, %v218_v33 }
  0x93   : > { %v226_v43 = vadd.f32 %v225_v40, %v219_v36 }
  0x95   : > { %v227_v45 = vadd.f32 %v226_v43, %v220_v39 }
  0x97   : > { %v228_v46 = vadd.f32 %v227_v45, %v221_v42 }
  0x99   : > { %v229_v48 = vadd.f32 %v228_v46, %v222_v44 }
  0x9b   : > { %v230_v49 = vadd.f32 %v229_v48, %v214_v47 }
  0x9d   : > { %231 = vst [vmem:[%s681_s9] sm:$0xff] %v230_v49 }
  0x9e PF: > { %p367_p9 = scmp.ne.s32.totalorder %s592_s23, 5 }
  0x9f   : > { %v603_v50 = vmov (!%p367_p9), 0.0   ;;  %s604_s19 = smov (!%p367_p9), [#allocation2]   ;;  %s504_s27 = scalar_lea.hbm (!%p367_p9), %s815_s5, 1152 }
  0xa0   : > { %235 = sbr.rel (%p367_p9) target bundleno = 201 (0xc9), region = 86  ;;  %236 = vst [vmem:[%s681_s9] sm:$0xff] (!%p367_p9), %v603_v50  ;;  %s244_s20 = sshll.u32 (!%p367_p9), %s604_s19, 4  ;;  %s245_s20 = int_to_ptr.vmem [resolvable:$true] %s244_s20 }
  0xa1   : > { %p505_p10 = scmp.ne.s32.totalorder (!%p367_p9), %s815_s5, %s504_s27  ;;  %p508_p11 = scmp.lt.u32.totalorder (!%p367_p9), %s504_s27, %s815_s5 }
  0xa3   : > { %p510_p12 = pnand (!%p367_p9), %p508_p11, %p505_p10 }
  0xa7   : > { %513 = shalt.err (!%p510_p12)  }
  0xa8   : > { %s514_s13 = scalar_lea.vmem %s245_s20, 1152  ;;  %s518_s14 = scalar_lea.vmem %s245_s20, 65536 }
  0xa9   : > { %p515_p13 = scmp.ne.s32.totalorder %s245_s20, %s514_s13  ;;  %p519_p0 = scmp.lt.s32.totalorder %s245_s20, %s245_s20 }
  0xaa   : > { %p520_p1 = scmp.lt.s32.totalorder %s518_s14, %s514_s13 }
  0xac   : > { %p521_p2 = por %p520_p1, %p519_p0 }
  0xae   : > { %p522_p3 = pnand %p521_p2, %p515_p13 }
  0xb0   : > { %525 = shalt.err (!%p522_p3)  }
  0xb1   : > { %247 = dma.hbm_to_vmem [thread:$0]  %s815_s5, 1152, %s245_s20, [#allocation4] }
  0xb2   : > { %576 = dma.done.wait [#allocation4], 1152 }
  0xb3   : > { %577 = vsyncadd [#allocation4], 4294966144  ;;  %v251_v51 = vld [vmem:[#allocation2] sm:$0xff]  ;;  %v252_v52 = vld [vmem:[#allocation2 + $0x8] sm:$0xff] }
  0xb4   : > { %v253_v53 = vld [vmem:[#allocation2 + $0x10] sm:$0xff]  ;;  %v254_v54 = vld [vmem:[#allocation2 + $0x18] sm:$0xff]  ;;  %v261_v55 = vmul.f32 %v251_v51, %v251_v51  ;;  %v262_v56 = vmul.f32 %v252_v52, %v252_v52  ;;  %v255_v58 = vld [vmem:[#allocation2 + $0x20] sm:$0xff] }
  0xb5   : > { %v263_v57 = vmul.f32 %v253_v53, %v253_v53  ;;  %v264_v59 = vmul.f32 %v254_v54, %v254_v54  ;;  %v256_v61 = vld [vmem:[#allocation2 + $0x28] sm:$0xff]  ;;  %v265_v62 = vmul.f32 %v255_v58, %v255_v58  ;;  %v257_v0 = vld [vmem:[#allocation2 + $0x30] sm:$0xff]  ;;  %v258_v3 = vld [vmem:[#allocation2 + $0x38] sm:$0xff] }
  0xb6   : > { %v270_v60 = vadd.f32 %v262_v56, %v261_v55  ;;  %v266_v1 = vmul.f32 %v256_v61, %v256_v61  ;;  %v267_v4 = vmul.f32 %v257_v0, %v257_v0  ;;  %v259_v6 = vld [vmem:[#allocation2 + $0x40] sm:$0xff]  ;;  %v268_v7 = vmul.f32 %v258_v3, %v258_v3 }
  0xb7   : > { %v269_v9 = vmul.f32 %v259_v6, %v259_v6  ;;  %v260_v12 = vld [vmem:[%s681_s9] sm:$0xff] }
  0xb8   : > { %v271_v63 = vadd.f32 %v270_v60, %v263_v57 }
  0xba   : > { %v272_v2 = vadd.f32 %v271_v63, %v264_v59 }
  0xbc   : > { %v273_v5 = vadd.f32 %v272_v2, %v265_v62 }
  0xbe   : > { %v274_v8 = vadd.f32 %v273_v5, %v266_v1 }
  0xc0   : > { %v275_v10 = vadd.f32 %v274_v8, %v267_v4 }
  0xc2   : > { %v276_v11 = vadd.f32 %v275_v10, %v268_v7 }
  0xc4   : > { %v277_v13 = vadd.f32 %v276_v11, %v269_v9 }
  0xc6   : > { %v278_v14 = vadd.f32 %v277_v13, %v260_v12 }
  0xc8   : > { %279 = vst [vmem:[%s681_s9] sm:$0xff] %v278_v14 }
  0xc9 PF: > { %s369_s17 = sshll.u32 %s592_s23, 7  ;;  %s294_s24 = sshll.u32 %s681_s9, 4  ;;  %s295_s24 = int_to_ptr.vmem [resolvable:$true] %s294_s24 }
  0xca   : > { %s774_s20 = scalar_lea.hbm %s816_s6, %s369_s17  ;;  %s281_s26 = scalar_lea.sflag [#allocation6], %s49_s7 }
  0xcb   : > { %s526_s27 = scalar_lea.vmem %s295_s24, 128  ;;  %s605_s8 = smov [#allocation5]  }
  0xcc   : > { %p527_p5 = scmp.ne.s32.totalorder %s295_s24, %s526_s27  ;;  %s530_s10 = sshll.u32 %s605_s8, 4  ;;  %s531_s10 = int_to_ptr.vmem [resolvable:$false] %s530_s10 }
  0xcd   : > { %s532_s11 = scalar_lea.vmem %s531_s10, 256  ;;  %p533_p9 = scmp.lt.s32.totalorder %s295_s24, %s531_s10 }
  0xce   : > { %p528_p7 = pnand %p527_p5, %p669_p4  ;;  %p534_p10 = scmp.lt.s32.totalorder %s532_s11, %s526_s27 }
  0xd0   : > { %p529_p8 = pneg %p528_p7  ;;  %p535_p11 = por %p534_p10, %p533_p9 }
  0xd2   : > { %p536_p12 = pnand %p535_p11, %p529_p8 }
  0xd4   : > { %539 = shalt.err (!%p536_p12)
}
  0xd5   : > { %s540_s7 = scalar_lea.hbm %s774_s20, 128  ;;  %s544_s13 = scalar_lea.hbm %s816_s6, 768 }
  0xd6   : > { %p541_p13 = scmp.ne.s32.totalorder %s774_s20, %s540_s7  ;;  %p545_p2 = scmp.lt.u32.totalorder %s774_s20, %s816_s6 }
  0xd7   : > { %p546_p3 = scmp.lt.u32.totalorder %s544_s13, %s540_s7  ;;  %p548_p7 = scmp.lt.u32.totalorder %s540_s7, %s774_s20 }
  0xd8   : > { %p542_p0 = pnand %p541_p13, %p669_p4 }
  0xd9   : > { %p547_p5 = por %p546_p3, %p545_p2 }
  0xda   : > { %p543_p1 = pneg %p542_p0 }
  0xdb   : > { %p549_p8 = por %p548_p7, %p547_p5 }
  0xdd   : > { %p550_p9 = pnand %p549_p8, %p543_p1 }
  0xdf   : > { %553 = shalt.err (!%p550_p9)
}
  0xe0   : > { %374 = dma.vmem_to_hbm [thread:$0]  (%p669_p4), %s295_s24, 128, %s774_s20, %s281_s26  }
  0xe1 PF: > { %p380_p10 = scmp.ge.s32.totalorder %s592_s23, 1  ;;  %s306_s16 = sand.u32 1, %s584_s21  }
  0xe2   : > { %s307_s17 = scalar_lea.sflag [#allocation6], %s306_s16 }
  0xe3   : > { %p377_p11 = pnand %p380_p10, %p673_p6 }
  0xe5   : > { %579 = dma.done.wait (!%p377_p11), %s307_s17, 128  }
  0xe6   : > { %581 = vsyncadd (!%p377_p11), %s307_s17, 4294967168  ;;  %p16_p12 = scmp.ge.s32.totalorder %s658_s25, 7   ;;  %s819_s21 = smov %s588_s22 }
  0xe7   : > { %s820_s22 = smov %s667_s28  ;;  %s821_s23 = smov %s658_s25 }
  0xe8   :  { %18 = sbr.rel (!%p16_p12) target bundleno = 3 (0x3), region = 131 }
  0xef   :  { %312 = vsyncpa [#allocation6], 1 }
  0xf0   :  { %314 = vsyncpa [#allocation6 + $0x1], 1 }
  0xf1   :  { %315 = vsyncmov [#allocation4] }
  0xf4   :  { %s316_s23 = vpop.sfrf %315 }
  0xf5   :  { %p372_p4 = scmp.ne.s32.totalorder %s316_s23, 0 }
  0xf7   :  { %320 = shalt.err (%p372_p4)  }
  0xf8   :  { %322 = vsyncmov [#allocation4 + $0x1] }
  0xfb   :  { %s323_s29 = vpop.sfrf %322 }
  0xfc   :  { %p373_p6 = scmp.ne.s32.totalorder %s323_s29, 0 }
  0xfe   :  { %327 = shalt.err (%p373_p6)  }

</bundles_post_ra>
